<compile_context>
chip_gen: v7x
topology: tpu7x:2x2x1
jax: 0.10.0
libtpu: 0.0.40
codegen_flags: <defaults>
</compile_context>

<pallas_src>
import functools

import jax
import jax.numpy as jnp
from jax.experimental import pallas as pl
from jax.experimental.pallas import tpu as pltpu


def _bert_embeddings_kernel(idflat_ref,                 # scalar-prefetch: [B*S_pad] int32 (SMEM)
                            tid_ref,                    # [ts, 1]  int32 token-type ids
                            pos_ref,                    # [ts, H]  position rows for this tile
                            type_ref,                   # [T,  H]  token-type table (resident)
                            ln_ref,                     # [2,  H]  gamma/beta packed
                            word_hbm,                   # [V,  H]  word table (HBM, pl.ANY)
                            o_ref,                      # [ts, H]  output tile
                            wbuf,                       # [ts, H]  VMEM gather buffer (scratch)
                            sem,                        # DMA semaphore (scratch)
                            *, eps, s_pad, ts, num_types, vocab):
    b = pl.program_id(0)
    j = pl.program_id(1)
    base = b * s_pad + j * ts

    # --- 1) Kick off the HBM row gather for this tile's word embeddings. ----
    # Contract: out-of-range ids are clamped to [0, vocab) (PyTorch would
    # raise; a silent clamp is documented here instead of an OOB DMA).
    @pl.loop(0, ts)
    def _issue(r):
        row = idflat_ref[base + r]
        row = jnp.minimum(jnp.maximum(row, 0), vocab - 1)
        pltpu.make_async_copy(word_hbm.at[pl.ds(row, 1), :],
                              wbuf.at[pl.ds(r, 1), :], sem).start()

    # --- 2) While the gather is in flight: position slice + type select. ----
    tid = tid_ref[...]                                   # (ts, 1) int32
    type_f32 = type_ref[...].astype(jnp.float32)         # (T, H)
    t_emb = type_f32[0:1, :]                             # row 0 default
    for t in range(1, num_types):                        # tiny VPU select chain
        t_emb = jnp.where(tid == t, type_f32[t:t + 1, :], t_emb)
    emb = pos_ref[...].astype(jnp.float32) + t_emb       # (ts, H)

    # --- 3) Drain the gather: one wait per issued copy (all equal-sized). ---
    @pl.loop(0, ts)
    def _drain(r):
        pltpu.make_async_copy(word_hbm.at[pl.ds(0, 1), :],
                              wbuf.at[pl.ds(0, 1), :], sem).wait()

    emb = emb + wbuf[...].astype(jnp.float32)

    # --- 4) LayerNorm over the hidden axis (exact two-pass, f32). -----------
    mean = jnp.mean(emb, axis=-1, keepdims=True)
    var = jnp.mean(jnp.square(emb - mean), axis=-1, keepdims=True)
    normed = (emb - mean) * jax.lax.rsqrt(var + eps)
    gamma = ln_ref[0:1, :].astype(jnp.float32)
    beta = ln_ref[1:2, :].astype(jnp.float32)

    # Dropout is identity (eval semantics).
    o_ref[...] = (normed * gamma + beta).astype(o_ref.dtype)


def bert_embeddings(input_ids, word_table, pos_table, type_table, gamma, beta,
                    *, token_type_ids=None, position_ids=None,
                    past_key_values_length=0, eps=1e-12, ts=None):
    """input_ids: [B, S] int.  word_table: [V, H], pos_table: [Pmax, H],
    type_table: [T, H], gamma/beta: [H].  Returns [B, S, H]."""
    B, S = input_ids.shape
    V, H = word_table.shape
    T = type_table.shape[0]
    Pmax = pos_table.shape[0]
    dtype = word_table.dtype

    if token_type_ids is None:
        token_type_ids = jnp.zeros((B, S), jnp.int32)
    if position_ids is None:
        pos_row_ids = (past_key_values_length
                       + jnp.arange(S, dtype=jnp.int32))
    else:
        # Batch-uniform absolute positions (the module's standard path).
        # TODO(synk): per-example position_ids would need a per-token gather.
        pos_row_ids = position_ids.reshape(-1, S)[0].astype(jnp.int32)

    # Pad the sequence axis to a sublane multiple; pick a tile that divides it
    # and keeps the f32 working tile modest (vreg pressure at large H).
    S_pad = ((S + 7) // 8) * 8
    if ts is None:
        ts = S_pad
        for cand in (256, 128, 64, 32, 16, 8):
            if S_pad % cand == 0 and cand * H * 4 <= 256 * 1024:
                ts = cand
                break
    nS = S_pad // ts
    N = B * S_pad
    pad = S_pad - S

    # Flattened word ids for scalar prefetch (SMEM), type ids as a thin VMEM
    # column, position rows as a contiguous (S_pad, H) slab, LN params packed.
    ids_flat = jnp.pad(input_ids.astype(jnp.int32), ((0, 0), (0, pad))).reshape(N)
    tids = jnp.pad(token_type_ids.astype(jnp.int32), ((0, 0), (0, pad))).reshape(N, 1)
    pos_row_ids = jnp.pad(pos_row_ids, (0, pad))
    pos_rows = jnp.take(pos_table, jnp.clip(pos_row_ids, 0, Pmax - 1), axis=0)
    ln = jnp.stack([gamma, beta], axis=0)                # [2, H]

    dbytes = jnp.dtype(dtype).itemsize
    cost = pl.CostEstimate(
        flops=10 * N * H,                                # adds + LayerNorm arithmetic
        transcendentals=N,                               # one rsqrt per token
        bytes_accessed=(2 * N * H * dbytes               # word gather in + output out
                        + S_pad * H * dbytes             # position rows
                        + (T + 2) * H * dbytes           # type table + LN params
                        + N * 8))                        # word ids (SMEM) + type ids

    kernel = functools.partial(_bert_embeddings_kernel, eps=eps, s_pad=S_pad,
                               ts=ts, num_types=T, vocab=V)

    out = pl.pallas_call(
        kernel,
        out_shape=jax.ShapeDtypeStruct((N, H), dtype),
        grid_spec=pltpu.PrefetchScalarGridSpec(
            num_scalar_prefetch=1,
            grid=(B, nS),
            in_specs=[
                pl.BlockSpec((ts, 1), lambda b, j, idr: (b * nS + j, 0)),  # type ids
                pl.BlockSpec((ts, H), lambda b, j, idr: (j, 0)),           # position rows
                pl.BlockSpec((T, H), lambda b, j, idr: (0, 0)),            # type table
                pl.BlockSpec((2, H), lambda b, j, idr: (0, 0)),            # LN gamma/beta
                pl.BlockSpec(memory_space=pl.ANY),                         # word table (HBM)
            ],
            out_specs=pl.BlockSpec((ts, H), lambda b, j, idr: (b * nS + j, 0)),
            scratch_shapes=[pltpu.VMEM((ts, H), dtype),
                            pltpu.SemaphoreType.DMA],
        ),
        compiler_params=pltpu.CompilerParams(
            dimension_semantics=("parallel", "parallel")),
        cost_estimate=cost,
    )(ids_flat, tids, pos_rows, type_table, ln, word_table)

    return out.reshape(B, S_pad, H)[:, :S, :]


def _reference(input_ids, token_type_ids, position_ids,
               word_table, pos_table, type_table, gamma, beta, eps):
    e = (word_table[input_ids]
         + type_table[token_type_ids]
         + pos_table[position_ids])
    mean = e.mean(-1, keepdims=True)
    var = ((e - mean) ** 2).mean(-1, keepdims=True)
    return (e - mean) / jnp.sqrt(var + eps) * gamma + beta


if __name__ == "__main__":
    # Small BERT-like config: vocab=512, hidden=128 (lane-dense), max_pos=128,
    # type_vocab=2, pad_token_id=0, layer_norm_eps=1e-12.
    B, S, H = 4, 64, 128
    VOCAB, MAX_POS, TYPE_VOCAB = 512, 128, 2
    EPS = 1e-12

    key = jax.random.PRNGKey(0)
    k_ids, k_typ, k_w, k_p, k_t, k_g, k_b = jax.random.split(key, 7)

    input_ids = jax.random.randint(k_ids, (B, S), 0, VOCAB, dtype=jnp.int32)
    token_type_ids = jax.random.randint(k_typ, (B, S), 0, TYPE_VOCAB, dtype=jnp.int32)
    position_ids = jnp.broadcast_to(jnp.arange(S, dtype=jnp.int32)[None, :], (B, S))

    word_table = 0.02 * jax.random.normal(k_w, (VOCAB, H), jnp.float32)
    word_table = word_table.at[0].set(0.0)           # padding_idx=0 -> zero row
    pos_table = 0.02 * jax.random.normal(k_p, (MAX_POS, H), jnp.float32)
    type_table = 0.02 * jax.random.normal(k_t, (TYPE_VOCAB, H), jnp.float32)
    gamma = 1.0 + 0.1 * jax.random.normal(k_g, (H,), jnp.float32)
    beta = 0.05 * jax.random.normal(k_b, (H,), jnp.float32)

    out = bert_embeddings(input_ids, word_table, pos_table, type_table, gamma, beta,
                          token_type_ids=token_type_ids, position_ids=position_ids,
                          eps=EPS)
    out = jax.block_until_ready(out)

    ref = _reference(input_ids, token_type_ids, position_ids,
                     word_table, pos_table, type_table, gamma, beta, EPS)
    assert out.shape == (B, S, H)
    err = float(jnp.max(jnp.abs(out - ref)))
    assert jnp.allclose(out, ref, atol=1e-4, rtol=1e-4), err
    print("KERNEL_OK")
</pallas_src>

<mosaic_0001>
module attributes {stable_mosaic.version = 11 : i64} {
  func.func @_bert_embeddings_kernel(%arg0: i32, %arg1: i32, %arg2: memref<256xi32, #tpu.memory_space<smem>>, %arg3: memref<64x1xi32, #tpu.memory_space<vmem>>, %arg4: memref<64x128xf32, #tpu.memory_space<vmem>>, %arg5: memref<2x128xf32, #tpu.memory_space<vmem>>, %arg6: memref<2x128xf32, #tpu.memory_space<vmem>>, %arg7: memref<512x128xf32, #tpu.memory_space<any>>, %arg8: memref<64x128xf32, #tpu.memory_space<vmem>>, %arg9: memref<64x128xf32, #tpu.memory_space<vmem>>, %arg10: memref<!tpu.dma_semaphore, #tpu.memory_space<semaphore_mem>>) attributes {dimension_semantics = [#tpu.dimension_semantics<parallel>, #tpu.dimension_semantics<parallel>], iteration_bounds = array<i64: 4, 1>, scalar_prefetch = 1 : i64, scratch_operands = 2 : i64, tpu.core_type = #tpu.core_type<tc>, window_params = [{transform_indices = @transform_0, window_bounds = array<i64: 64, 1>}, {transform_indices = @transform_1, window_bounds = array<i64: 64, 128>}, {pipeline_mode = #tpu.pipeline_mode<synchronous>, transform_indices = @transform_2, window_bounds = array<i64: 2, 128>}, {pipeline_mode = #tpu.pipeline_mode<synchronous>, transform_indices = @transform_3, window_bounds = array<i64: 2, 128>}, {}, {transform_indices = @transform_5, window_bounds = array<i64: 64, 128>}]} {
    %c64_i32 = arith.constant 64 : i32
    %0 = arith.muli %arg0, %c64_i32 : i32
    %c64_i32_0 = arith.constant 64 : i32
    %1 = arith.muli %arg1, %c64_i32_0 : i32
    %2 = arith.addi %0, %1 : i32
    %c0_i32 = arith.constant 0 : i32
    %c64_i32_1 = arith.constant 64 : i32
    %3 = arith.addi %c0_i32, %c64_i32_1 : i32
    %c1_i32 = arith.constant 1 : i32
    scf.for %arg11 = %c0_i32 to %3 step %c1_i32  : i32 {
      %c1_i32_23 = arith.constant 1 : i32
      %47 = arith.muli %arg11, %c1_i32_23 : i32
      %c0_i32_24 = arith.constant 0 : i32
      %48 = arith.addi %c0_i32_24, %47 : i32
      %49 = arith.addi %2, %48 : i32
      %50 = arith.index_cast %49 : i32 to index
      %51 = memref.load %arg2[%50] : memref<256xi32, #tpu.memory_space<smem>>
      %c0_i32_25 = arith.constant 0 : i32
      %52 = arith.maxsi %51, %c0_i32_25 : i32
      %c511_i32 = arith.constant 511 : i32
      %53 = arith.minsi %52, %c511_i32 : i32
      %c0_i32_26 = arith.constant 0 : i32
      %54 = tpu.memref_slice %arg7[%53, %c0_i32_26] : memref<512x128xf32, #tpu.memory_space<any>> -> memref<1x128xf32, #tpu.memory_space<any>>
      %c0_i32_27 = arith.constant 0 : i32
      %55 = tpu.memref_slice %arg9[%48, %c0_i32_27] : memref<64x128xf32, #tpu.memory_space<vmem>> -> memref<1x128xf32, #tpu.memory_space<vmem>>
      tpu.enqueue_dma source(%54 : memref<1x128xf32, #tpu.memory_space<any>>) target(%55 : memref<1x128xf32, #tpu.memory_space<vmem>>) target_semaphore(%arg10 : memref<!tpu.dma_semaphore, #tpu.memory_space<semaphore_mem>>)
    }
    %c64_i32_2 = arith.constant 64 : i32
    %c0 = arith.constant 0 : index
    %c0_3 = arith.constant 0 : index
    %4 = vector.load %arg3[%c0, %c0_3] : memref<64x1xi32, #tpu.memory_space<vmem>>, vector<64x1xi32>
    %c0_4 = arith.constant 0 : index
    %c0_5 = arith.constant 0 : index
    %5 = vector.load %arg5[%c0_4, %c0_5] : memref<2x128xf32, #tpu.memory_space<vmem>>, vector<2x128xf32>
    %6 = vector.extract_strided_slice %5 {offsets = [0, 0], sizes = [1, 128], strides = [1, 1]} : vector<2x128xf32> to vector<1x128xf32>
    %c1_i32_6 = arith.constant 1 : i32
    %7 = vector.broadcast %c1_i32_6 : i32 to vector<64x1xi32>
    %8 = arith.cmpi eq, %4, %7 : vector<64x1xi32>
    %9 = vector.extract_strided_slice %5 {offsets = [1, 0], sizes = [1, 128], strides = [1, 1]} : vector<2x128xf32> to vector<1x128xf32>
    %10 = vector.shape_cast %8 : vector<64x1xi1> to vector<64x1xi1>
    %11 = vector.broadcast %10 : vector<64x1xi1> to vector<64x128xi1>
    %12 = vector.shape_cast %9 : vector<1x128xf32> to vector<1x128xf32>
    %13 = vector.broadcast %12 : vector<1x128xf32> to vector<64x128xf32>
    %14 = vector.shape_cast %6 : vector<1x128xf32> to vector<1x128xf32>
    %15 = vector.broadcast %14 : vector<1x128xf32> to vector<64x128xf32>
    %16 = arith.select %11, %13, %15 : vector<64x128xi1>, vector<64x128xf32>
    %c0_7 = arith.constant 0 : index
    %c0_8 = arith.constant 0 : index
    %17 = vector.load %arg4[%c0_7, %c0_8] : memref<64x128xf32, #tpu.memory_space<vmem>>, vector<64x128xf32>
    %18 = arith.addf %17, %16 : vector<64x128xf32>
    %c0_i32_9 = arith.constant 0 : i32
    %c64_i32_10 = arith.constant 64 : i32
    %19 = arith.addi %c0_i32_9, %c64_i32_10 : i32
    %c1_i32_11 = arith.constant 1 : i32
    scf.for %arg11 = %c0_i32_9 to %19 step %c1_i32_11  : i32 {
      %c0_i32_23 = arith.constant 0 : i32
      %c0_i32_24 = arith.constant 0 : i32
      %47 = tpu.memref_slice %arg7[%c0_i32_23, %c0_i32_24] : memref<512x128xf32, #tpu.memory_space<any>> -> memref<1x128xf32, #tpu.memory_space<any>>
      %c0_i32_25 = arith.constant 0 : i32
      %c0_i32_26 = arith.constant 0 : i32
      %48 = tpu.memref_slice %arg9[%c0_i32_25, %c0_i32_26] : memref<64x128xf32, #tpu.memory_space<vmem>> -> memref<1x128xf32, #tpu.memory_space<vmem>>
      tpu.wait_dma2 semaphore(%arg10 : memref<!tpu.dma_semaphore, #tpu.memory_space<semaphore_mem>>) src(%47 : memref<1x128xf32, #tpu.memory_space<any>>) dst(%48 : memref<1x128xf32, #tpu.memory_space<vmem>>)
    }
    %c0_12 = arith.constant 0 : index
    %c0_13 = arith.constant 0 : index
    %20 = vector.load %arg9[%c0_12, %c0_13] : memref<64x128xf32, #tpu.memory_space<vmem>>, vector<64x128xf32>
    %21 = arith.addf %18, %20 : vector<64x128xf32>
    %cst = arith.constant dense<0.000000e+00> : vector<64xf32>
    %22 = vector.multi_reduction <add>, %21, %cst [1] : vector<64x128xf32> to vector<64xf32>
    %23 = vector.shape_cast %22 : vector<64xf32> to vector<64x1xf32>
    %cst_14 = arith.constant 1.280000e+02 : f32
    %24 = vector.broadcast %cst_14 : f32 to vector<64x1xf32>
    %25 = arith.divf %23, %24 : vector<64x1xf32>
    %26 = vector.broadcast %25 : vector<64x1xf32> to vector<64x128xf32>
    %27 = arith.subf %21, %26 : vector<64x128xf32>
    %28 = arith.mulf %27, %27 : vector<64x128xf32>
    %cst_15 = arith.constant dense<0.000000e+00> : vector<64xf32>
    %29 = vector.multi_reduction <add>, %28, %cst_15 [1] : vector<64x128xf32> to vector<64xf32>
    %30 = vector.shape_cast %29 : vector<64xf32> to vector<64x1xf32>
    %cst_16 = arith.constant 1.280000e+02 : f32
    %31 = vector.broadcast %cst_16 : f32 to vector<64x1xf32>
    %32 = arith.divf %30, %31 : vector<64x1xf32>
    %33 = vector.broadcast %25 : vector<64x1xf32> to vector<64x128xf32>
    %34 = arith.subf %21, %33 : vector<64x128xf32>
    %cst_17 = arith.constant 9.99999996E-13 : f32
    %35 = vector.broadcast %cst_17 : f32 to vector<64x1xf32>
    %36 = arith.addf %32, %35 : vector<64x1xf32>
    %37 = math.rsqrt %36 : vector<64x1xf32>
    %38 = vector.broadcast %37 : vector<64x1xf32> to vector<64x128xf32>
    %39 = arith.mulf %34, %38 : vector<64x128xf32>
    %c0_18 = arith.constant 0 : index
    %c0_19 = arith.constant 0 : index
    %40 = vector.load %arg6[%c0_18, %c0_19] : memref<2x128xf32, #tpu.memory_space<vmem>>, vector<1x128xf32>
    %c1 = arith.constant 1 : index
    %c0_20 = arith.constant 0 : index
    %41 = vector.load %arg6[%c1, %c0_20] : memref<2x128xf32, #tpu.memory_space<vmem>>, vector<1x128xf32>
    %42 = vector.broadcast %40 : vector<1x128xf32> to vector<64x128xf32>
    %43 = arith.mulf %39, %42 : vector<64x128xf32>
    %44 = vector.broadcast %41 : vector<1x128xf32> to vector<64x128xf32>
    %45 = arith.addf %43, %44 : vector<64x128xf32>
    %c0_21 = arith.constant 0 : index
    %c0_22 = arith.constant 0 : index
    %46 = vector.load %arg8[%c0_21, %c0_22] : memref<64x128xf32, #tpu.memory_space<vmem>>, vector<64x128xf32>
    tpu.vector_store %arg8[%c0_21, %c0_22], %45 {strides = array<i32>} : memref<64x128xf32, #tpu.memory_space<vmem>>, vector<64x128xf32>,
    return
  }
  func.func @transform_0(%arg0: i32, %arg1: i32, %arg2: memref<256xi32, #tpu.memory_space<smem>>) -> (i32, i32) {
    %c1_i32 = arith.constant 1 : i32
    %0 = arith.muli %arg0, %c1_i32 : i32
    %1 = arith.addi %0, %arg1 : i32
    %c0_i32 = arith.constant 0 : i32
    %c0_i32_0 = arith.constant 0 : i32
    return %1, %c0_i32 : i32, i32
  }
  func.func @transform_1(%arg0: i32, %arg1: i32, %arg2: memref<256xi32, #tpu.memory_space<smem>>) -> (i32, i32) {
    %c0_i32 = arith.constant 0 : i32
    %c0_i32_0 = arith.constant 0 : i32
    return %arg1, %c0_i32 : i32, i32
  }
  func.func @transform_2(%arg0: i32, %arg1: i32, %arg2: memref<256xi32, #tpu.memory_space<smem>>) -> (i32, i32) {
    %c0_i32 = arith.constant 0 : i32
    %c0_i32_0 = arith.constant 0 : i32
    %c0_i32_1 = arith.constant 0 : i32
    return %c0_i32, %c0_i32_0 : i32, i32
  }
  func.func @transform_3(%arg0: i32, %arg1: i32, %arg2: memref<256xi32, #tpu.memory_space<smem>>) -> (i32, i32) {
    %c0_i32 = arith.constant 0 : i32
    %c0_i32_0 = arith.constant 0 : i32
    %c0_i32_1 = arith.constant 0 : i32
    return %c0_i32, %c0_i32_0 : i32, i32
  }
  func.func @transform_5(%arg0: i32, %arg1: i32, %arg2: memref<256xi32, #tpu.memory_space<smem>>) -> (i32, i32) {
    %c1_i32 = arith.constant 1 : i32
    %0 = arith.muli %arg0, %c1_i32 : i32
    %1 = arith.addi %0, %arg1 : i32
    %c0_i32 = arith.constant 0 : i32
    %c0_i32_0 = arith.constant 0 : i32
    return %1, %c0_i32 : i32, i32
  }
}

</mosaic_0001>

<bundles_post_ra>
// kernel: tpu_custom_call.1
= control target key start
LH: loop header
LB: loop body
LE: loop exit
PB: predicated region body
PF: predicated region fallthrough
CT: control target
= control target key end

     0   :  { %s1171_s0 = inlined_call_operand.vmem [shape: s32[256], index: 0, kind: input, shape index: {}]   ;;  %s1172_s1 = inlined_call_operand.vmem [shape: s32[256,1], index: 1, kind: input, shape index: {}]   ;;  %s1173_s2 = inlined_call_operand.vmem [shape: f32[64,128], index: 2, kind: input, shape index: {}]   ;;  %s1174_s3 = inlined_call_operand.vmem [shape: f32[2,128], index: 3, kind: input, shape index: {}]   ;;  %s1175_s4 = inlined_call_operand.vmem [shape: f32[2,128], index: 4, kind: input, shape index: {}]   ;;  %s1176_s5 = inlined_call_operand.hbm [shape: f32[512,128], index: 5, kind: input, shape index: {}]   ;;  %s1177_s6 = inlined_call_operand.hbm [shape: f32[256,128], index: 6, kind: output, shape index: {}]  }
   0x1   :  { %1179 = sst [smem:[#allocation15_spill]] %s1172_s1  ;;  %s11_s23 = sshll.u32 %s1171_s0, 4  ;;  %s12_s23 = int_to_ptr.vmem [resolvable:$true] %s11_s23 }
   0x2   :  { %s757_s24 = scalar_lea.vmem %s12_s23, 32  ;;  %p762_p1 = scmp.lt.s32.totalorder %s12_s23, %s12_s23 }
   0x3   :  { %p758_p0 = scmp.ne.s32.totalorder %s12_s23, %s757_s24  ;;  %p763_p2 = scmp.lt.s32.totalorder %s757_s24, %s757_s24 }
   0x5   :  { %p764_p3 = por %p763_p2, %p762_p1 }
   0x7   :  { %p765_p4 = pnand %p764_p3, %p758_p0 }
   0x9   :  { %768 = shalt.err (!%p765_p4)  }
   0xa   :  { %s893_s25 = smov [#allocation5]  }
   0xb   :  { %14 = dma.vmem_to_smem %s12_s23, 32, %s893_s25, [#allocation4] }
   0xc   :  { %853 = dma.done.wait [#allocation4], 32 }
   0xd   :  { %854 = vsyncadd [#allocation4], 4294967264 }
   0xe   :  { %16 = sfence }
   0xf   :  { %17 = vsyncpa [#allocation7], 0 }
  0x10   :  { %19 = vsyncpa [#allocation7 + $0x1], 0  ;;  %s937_s26 = smov 0   ;;  %s939_s27 = smov 0  }
  0x11   :  { %s941_s0 = smov 0   ;;  %s943_s28 = smov 0  }
  0x12   :  { %s945_s29 = smov 0   ;;  %s947_s30 = smov 0  }
  0x13 LB: > { %s637_s7 = sadd.s32 4294967295, %s883_s30   ;;  %s638_s8 = sadd.s32 4294967294, %s883_s30   ;;  %s883_s30 = sphi %s947_s30, %s25_s30   ;;  %s879_s29 = sphi %s945_s29, %s1190_s29   ;;  %s875_s28 = sphi %s943_s28, %s1189_s28   ;;  %s871_s0 = sphi %s941_s0, %s1188_s0   ;;  %s867_s27 = sphi %s939_s27, %s1187_s27   ;;  %s863_s26 = sphi %s937_s26, %s1186_s26  }
  0x14   : > { %s37_s9 = sadd.s32 1, %s879_s29  ;;  %s142_s10 = sadd.s32 1, %s871_s0 }
  0x15   : > { %p39_p5 = scmp.ge.s32.totalorder %s37_s9, 4  ;;  %p152_p6 = scmp.ne.s32.totalorder %s871_s0, %s867_s27 }
  0x16   : > { %p153_p7 = scmp.eq.s32.totalorder %s637_s7, 3  ;;  %p158_p8 = scmp.ne.s32.totalorder %s867_s27, %s863_s26 }
  0x17   : > { %s1192_s9 = smov (%p39_p5, %s37_s9), 0  ;;  %p159_p10 = scmp.eq.s32.totalorder %s638_s8, 3 }
  0x18   : > { %p977_p9 = por %p153_p7, %p152_p6  ;;  %s139_s12 = ssub.s32 %s879_s29, %s1192_s9 }
  0x19   : > { %p642_p11 = scmp.ge.s32.totalorder %s883_s30, 1  ;;  %p140_p12 = scmp.eq.s32.totalorder %s139_s12, 0 }
  0x1a   : > { %p984_p13 = por %p159_p10, %p158_p8  ;;  %p203_p0 = scmp.lt.s32.totalorder %s883_s30, 5 }
  0x1b   : > { %s990_s14 = scalar_select %p140_p12, %s871_s0, %s142_s10  }
  0x1c   : > { %s1181_s13 = scalar_select %p984_p13, 1, 0 }
  0x1d   : > { %p204_p1 = pnand %p642_p11, %p203_p0 }
  0x1e   : > { %s1178_s15 = sand.u32 (!%p204_p1), 1, %s867_s27   ;;  %s644_s16 = sshll.u32 (!%p204_p1), %s875_s28, 3 }
  0x1f   : > { %207 = sbr.rel (%p204_p1) target bundleno = 572 (0x23c), region = 36  ;;  %s643_s17 = sshll.u32 (!%p204_p1), %s1178_s15, 6 }
  0x20   : > { %p237_p2 = scmp.lt.s32.totalorder (!%p204_p1), %s644_s16, 31  ;;  %s1182_s1 = sld [smem:[#allocation15_spill]] (!%p204_p1) }
  0x21   : > { %s1002_s23 = scalar_lea.vmem (!%p204_p1), [#allocation6], %s643_s17  ;;  %s1004_s24 = smov (!%p204_p1), 0  }
  0x26   : > { %s1194_s16 = smov (!%p237_p2, %s644_s16), 31 }
  0x27   : > { %s645_s19 = sshll.u32 %s1194_s16, 3 }
  0x28   : > { %s1000_s22 = scalar_lea.vmem %s1182_s1, %s645_s19 }
  0x29 LB: >> { %s1183_s18 = sshll.u32 %s875_s28, 6  ;;  %s268_s8 = scalar_lea.vmem [#allocation2], %s887_s24  ;;  %s887_s24 = sphi %s1004_s24, %s259_s24  }
  0x2a   : >> { %s260_s25 = sadd.s32 %s887_s24, %s1183_s18  ;;  %s276_s10 = sshll.u32 %s268_s8, 4  ;;  %s277_s10 = int_to_ptr.vmem [resolvable:$true] %s276_s10 }
  0x2b   : >> { %s261_s7 = sld [smem:[#allocation5 + %s260_s25]]  ;;  %s771_s1 = scalar_lea.hbm %s1176_s5, 8192 }
  0x31   : >> { %p262_p3 = scmp.gt.s32.totalorder %s261_s7, 0  ;;  %p647_p4 = scmp.lt.s32.totalorder %s261_s7, 511 }
  0x33   : >> { %s1196_s7 = smov (!%p262_p3, %s261_s7), 0 }
  0x34   : >> { %s1198_s7 = smov (!%p647_p4, %s1196_s7), 511 }
  0x35   : >> { %s652_s12 = sshll.u32 %s1198_s7, 4 }
  0x36   : >> { %s267_s19 = scalar_lea.hbm %s1176_s5, %s652_s12 }
  0x37   : >> { %s769_s20 = scalar_lea.hbm %s267_s19, 16  ;;  %p772_p6 = scmp.lt.u32.totalorder %s267_s19, %s1176_s5 }
  0x38   : >> { %p770_p5 = scmp.ne.s32.totalorder %s267_s19, %s769_s20  ;;  %p773_p7 = scmp.lt.u32.totalorder %s771_s1, %s769_s20 }
  0x39   : >> { %p775_p10 = scmp.lt.u32.totalorder %s769_s20, %s267_s19 }
  0x3a   : >> { %p774_p8 = por %p773_p7, %p772_p6 }
  0x3c   : >> { %p776_p11 = por %p775_p10, %p774_p8 }
  0x3e   : >> { %p777_p12 = pnand %p776_p11, %p770_p5 }
  0x40   : >> { %780 = shalt.err (!%p777_p12)  }
  0x41   : >> { %s781_s7 = scalar_lea.vmem %s277_s10, 16  ;;  %s894_s8 = smov [#allocation2]  }
  0x42   : >> { %p782_p0 = scmp.ne.s32.totalorder %s277_s10, %s781_s7  ;;  %s783_s12 = sshll.u32 %s894_s8, 4  ;;  %s784_s12 = int_to_ptr.vmem [resolvable:$false] %s783_s12 }
  0x43   : >> { %s785_s16 = scalar_lea.vmem %s784_s12, 1024  ;;  %p786_p1 = scmp.lt.s32.totalorder %s277_s10, %s784_s12 }
  0x44   : >> { %p787_p2 = scmp.lt.s32.totalorder %s785_s16, %s781_s7 }
  0x46   : >> { %p788_p3 = por %p787_p2, %p786_p1 }
  0x48   : >> { %p789_p4 = pnand %p788_p3, %p782_p0 }
  0x4a   : >> { %792 = shalt.err (!%p789_p4)  }
  0x4b   : >> { %279 = dma.hbm_to_vmem [thread:$0]  %s267_s19, 16, %s277_s10, [#allocation3] }
  0x4c   : >> { %s259_s24 = sadd.s32 1, %s887_s24  }
  0x4d   : >> { %p256_p13 = scmp.ge.s32.totalorder %s259_s24, 64  }
  0x4e   : > { %v282_v0 = vld [vmem:[%s1000_s22 + $0x10] sm:$0xff] (%p256_p13)  ;;  %v280_v1 = vld [vmem:[%s1000_s22] sm:$0xff] (%p256_p13)  ;;  %v283_v2 = vld [vmem:[%s1000_s22 + $0x18] sm:$0xff] (%p256_p13)  ;;  %v895_v3 = vmov (%p256_p13), 0   ;;  %v337_v17 = vlaneseq (%p256_p13) }
  0x4f   : > { %258 = sbr.rel (!%p256_p13) target bundleno = 41 (0x29), region = 94  ;;  %740 = vset.pattern.permute.xlu1 (%p256_p13), %v895_v3  ;;  %739 = vset.pattern.permute.xlu0 (%p256_p13), %v895_v3  ;;  %vm291_vm0 = vcmp.eq.s32.totalorder (%p256_p13), %v282_v0, 1  ;;  %vm289_vm1 = vcmp.eq.s32.totalorder (%p256_p13), %v280_v1, 1  ;;  %vm292_vm2 = vcmp.eq.s32.totalorder (%p256_p13), %v283_v2, 1  ;;  %v281_v4 = vld [vmem:[%s1000_s22 + $0x8] sm:$0xff] (%p256_p13)  ;;  %v284_v8 = vld [vmem:[%s1000_s22 + $0x20] sm:$0xff] (%p256_p13) }
  0x50   : > { %v299_v5 = vsel (%p256_p13), %vm291_vm0, 1, %v895_v3  ;;  %v297_v6 = vsel (%p256_p13), %vm289_vm1, 1, %v895_v3  ;;  %vm290_vm3 = vcmp.eq.s32.totalorder (%p256_p13), %v281_v4, 1  ;;  %v285_v7 = vld [vmem:[%s1000_s22 + $0x28] sm:$0xff] (%p256_p13)  ;;  %v300_v9 = vsel (%p256_p13), %vm292_vm2, 1, %v895_v3  ;;  %v287_v11 = vld [vmem:[%s1000_s22 + $0x38] sm:$0xff] (%p256_p13) }
  0x51   : > { %312 = vperm.xlu1 (%p256_p13), %740, %v299_v5   ;;  %306 = vperm.xlu0 (%p256_p13), %739, %v297_v6   ;;  %v298_v10 = vsel (%p256_p13), %vm290_vm3, 1, %v895_v3  ;;  %vm294_vm4 = vcmp.eq.s32.totalorder (%p256_p13), %v285_v7, 1  ;;  %vm293_vm5 = vcmp.eq.s32.totalorder (%p256_p13), %v284_v8, 1  ;;  %v286_v12 = vld [vmem:[%s1000_s22 + $0x30] sm:$0xff] (%p256_p13)  ;;  %vm296_vm6 = vcmp.eq.s32.totalorder (%p256_p13), %v287_v11, 1  ;;  %v353_v26 = vld [vmem:[%s1173_s2] sm:$0xff] (%p256_p13) }
  0x52   : > { %v302_v13 = vsel (%p256_p13), %vm294_vm4, 1, %v895_v3  ;;  %v301_v14 = vsel (%p256_p13), %vm293_vm5, 1, %v895_v3  ;;  %vm295_vm7 = vcmp.eq.s32.totalorder (%p256_p13), %v286_v12, 1  ;;  %v304_v15 = vsel (%p256_p13), %vm296_vm6, 1, %v895_v3  ;;  %v288_v21 = vld [vmem:[%s1174_s3] sm:$0x3] (%p256_p13) }
  0x53   : > { %v303_v16 = vsel (%p256_p13), %vm295_vm7, 1, %v895_v3  ;;  %v338_v18 = vshrl.u32 (%p256_p13), %v337_v17, 7  ;;  %v355_v24 = vld [vmem:[%s1173_s2 + $0x10] sm:$0xff] (%p256_p13)  ;;  %v356_v32 = vld [vmem:[%s1173_s2 + $0x18] sm:$0xff] (%p256_p13)  ;;  %v354_v34 = vld [vmem:[%s1173_s2 + $0x8] sm:$0xff] (%p256_p13)  ;;  %s889_s22 = smov (%p256_p13), 0  }
  0x54   : > { %v358_v40 = vld [vmem:[%s1173_s2 + $0x28] sm:$0xff] (%p256_p13)  ;;  %v357_v42 = vld [vmem:[%s1173_s2 + $0x20] sm:$0xff] (%p256_p13)  ;;  %v360_v48 = vld [vmem:[%s1173_s2 + $0x38] sm:$0xff] (%p256_p13) }
  0x55   : > { %315 = vperm.xlu1 (%p256_p13), %740, %v300_v9   ;;  %309 = vperm.xlu0 (%p256_p13), %739, %v298_v10   ;;  %v339_v19 = vsub.s32 (%p256_p13), 1, %v338_v18  ;;  %v343_v20 = vsub.s32 (%p256_p13), 0, %v338_v18  ;;  %v359_v50 = vld [vmem:[%s1173_s2 + $0x30] sm:$0xff] (%p256_p13) }
  0x57   : > { %v340_v22 = vrot.slane %v288_v21, %v339_v19  ;;  %v344_v23 = vrot.slane %v288_v21, %v343_v20 }
  0x59   : > { %321 = vperm.xlu1 %740, %v302_v13   ;;  %318 = vperm.xlu0 %739, %v301_v14  }
  0x5d   : > { %327 = vperm.xlu1 %740, %v304_v15   ;;  %324 = vperm.xlu0 %739, %v303_v16  }
  0xd0   : > { %v313_v25 = vpop.permute.xlu1 %312  ;;  %v307_v27 = vpop.permute.xlu0 %306 }
  0xd1   : > { %vm331_vm8 = vcmp.eq.s32.totalorder %v313_v25, 1  ;;  %vm329_vm9 = vcmp.eq.s32.totalorder %v307_v27, 1 }
  0xd2   : > { %v347_v28 = vsel %vm331_vm8, %v340_v22, %v344_v23  ;;  %v345_v29 = vsel %vm329_vm9, %v340_v22, %v344_v23 }
  0xd3   : > { %v363_v30 = vadd.f32 %v355_v24, %v347_v28  ;;  %v361_v31 = vadd.f32 %v353_v26, %v345_v29 }
  0xd4   : > { %v316_v33 = vpop.permute.xlu1 %315  ;;  %v310_v35 = vpop.permute.xlu0 %309 }
  0xd5   : > { %vm332_vm10 = vcmp.eq.s32.totalorder %v316_v33, 1  ;;  %vm330_vm11 = vcmp.eq.s32.totalorder %v310_v35, 1 }
  0xd6   : > { %v348_v36 = vsel %vm332_vm10, %v340_v22, %v344_v23  ;;  %v346_v37 = vsel %vm330_vm11, %v340_v22, %v344_v23 }
  0xd7   : > { %v364_v38 = vadd.f32 %v356_v32, %v348_v36  ;;  %v362_v39 = vadd.f32 %v354_v34, %v346_v37 }
  0xd8   : > { %v322_v41 = vpop.permute.xlu1 %321  ;;  %v319_v43 = vpop.permute.xlu0 %318 }
  0xd9   : > { %vm334_vm12 = vcmp.eq.s32.totalorder %v322_v41, 1  ;;  %vm333_vm13 = vcmp.eq.s32.totalorder %v319_v43, 1 }
  0xda   : > { %v350_v44 = vsel %vm334_vm12, %v340_v22, %v344_v23  ;;  %v349_v45 = vsel %vm333_vm13, %v340_v22, %v344_v23 }
  0xdb   : > { %v366_v46 = vadd.f32 %v358_v40, %v350_v44  ;;  %v365_v47 = vadd.f32 %v357_v42, %v349_v45 }
  0xdc   : > { %v328_v49 = vpop.permute.xlu1 %327  ;;  %v325_v51 = vpop.permute.xlu0 %324 }
  0xdd   : > { %vm336_vm14 = vcmp.eq.s32.totalorder %v328_v49, 1  ;;  %vm335_vm15 = vcmp.eq.s32.totalorder %v325_v51, 1 }
  0xde   : > { %v352_v52 = vsel %vm336_vm14, %v340_v22, %v344_v23  ;;  %v351_v53 = vsel %vm335_vm15, %v340_v22, %v344_v23 }
  0xdf   : > { %v368_v54 = vadd.f32 %v360_v48, %v352_v52  ;;  %v367_v55 = vadd.f32 %v359_v50, %v351_v53 }
  0xe0 LB: >> { %855 = dma.done.wait [#allocation3], 16  ;;  %s891_s22 = sphi %s889_s22, %s374_s22  }
  0xe1   : >> { %856 = vsyncadd [#allocation3], 4294967280  ;;  %s374_s22 = sadd.s32 1, %s891_s22  }
  0xe2   : >> { %p371_p13 = scmp.ge.s32.totalorder %s374_s22, 64  }
  0xe3   : > { %v378_v56 = vld [vmem:[#allocation2] sm:$0xff] (%p371_p13)  ;;  %v380_v57 = vld [vmem:[#allocation2 + $0x10] sm:$0xff] (%p371_p13)  ;;  %v379_v58 = vld [vmem:[#allocation2 + $0x8] sm:$0xff] (%p371_p13)  ;;  %s663_s20 = sshll.u32 (%p371_p13), %s875_s28, 10  ;;  %s532_s21 = sshll.u32 (%p371_p13), %s1002_s23, 4  ;;  %s1120_s21 = int_to_ptr.vmem [resolvable:$true] %s532_s21 }
  0xe4   : > { %373 = sbr.rel (!%p371_p13) target bundleno = 224 (0xe0), region = 105  ;;  %v386_v59 = vadd.f32 (%p371_p13), %v378_v56, %v361_v31  ;;  %v388_v60 = vadd.f32 (%p371_p13), %v380_v57, %v363_v30  ;;  %v381_v61 = vld [vmem:[#allocation2 + $0x18] sm:$0xff] (%p371_p13)  ;;  %v387_v62 = vadd.f32 (%p371_p13), %v379_v58, %v362_v39  ;;  %v382_v0 = vld [vmem:[#allocation2 + $0x20] sm:$0xff] (%p371_p13)  ;;  %v383_v1 = vld [vmem:[#allocation2 + $0x28] sm:$0xff] (%p371_p13)  ;;  %s1118_s8 = scalar_lea.hbm (%p371_p13), %s1177_s6, %s663_s20 }
  0xe5   : > { %v389_v63 = vadd.f32 (%p371_p13), %v381_v61, %v364_v38  ;;  %v390_v2 = vadd.f32 (%p371_p13), %v382_v0, %v365_v47  ;;  %v391_v3 = vadd.f32 (%p371_p13), %v383_v1, %v366_v46  ;;  %v384_v4 = vld [vmem:[#allocation2 + $0x30] sm:$0xff] (%p371_p13)  ;;  %v385_v5 = vld [vmem:[#allocation2 + $0x38] sm:$0xff] (%p371_p13)  ;;  %v654_v1 = vld [vmem:[%s1175_s4 + $0x1] ss:$0 sm:$0xff] (%p371_p13)  ;;  %s1184_s12 = sand.u32 (%p371_p13), 1, %s867_s27   ;;  %s793_s28 = scalar_lea.vmem (%p371_p13), %s1120_s21, 1024 }
  0xe6   : > { %394 = vadd.xlane.f32.xlu0 (%p371_p13), %v386_v59  ;;  %398 = vadd.xlane.f32.xlu1 (%p371_p13), %v388_v60  ;;  %v392_v6 = vadd.f32 (%p371_p13), %v384_v4, %v367_v55  ;;  %v393_v7 = vadd.f32 (%p371_p13), %v385_v5, %v368_v54  ;;  %s1125_s16 = scalar_lea.sflag (%p371_p13), [#allocation7], %s1184_s12  ;;  %p794_p5 = scmp.ne.s32.totalorder (%p371_p13), %s1120_s21, %s793_s28 }
  0xe7   : > { %s896_s1 = smov (%p371_p13), [#allocation6]  }
  0xe8   : > { %p795_p6 = pnand (%p371_p13), %p794_p5, %p977_p9  ;;  %s797_s15 = sshll.u32 (%p371_p13), %s896_s1, 4  ;;  %s798_s15 = int_to_ptr.vmem [resolvable:$false] %s797_s15 }
  0xe9   : > { %s799_s18 = scalar_lea.vmem (%p371_p13), %s798_s15, 2048  ;;  %p800_p8 = scmp.lt.s32.totalorder (%p371_p13), %s1120_s21, %s798_s15 }
  0xea   : > { %396 = vadd.xlane.f32.xlu0 (%p371_p13), %v387_v62  ;;  %400 = vadd.xlane.f32.xlu1 (%p371_p13), %v389_v63  ;;  %p796_p7 = pneg (%p371_p13), %p795_p6  ;;  %p801_p10 = scmp.lt.s32.totalorder (%p371_p13), %s799_s18, %s793_s28 }
  0xec   : > { %p802_p11 = por %p801_p10, %p800_p8 }
  0xee   : > { %402 = vadd.xlane.f32.xlu0 %v390_v2  ;;  %404 = vadd.xlane.f32.xlu1 %v391_v3  ;;  %p803_p12 = pnand %p802_p11, %p796_p7 }
  0xf2   : > { %406 = vadd.xlane.f32.xlu0 %v392_v6  ;;  %408 = vadd.xlane.f32.xlu1 %v393_v7 }
 0x173   : > { %v395_v8 = vpop.xlane.xlu0 %394  ;;  %v399_v9 = vpop.xlane.xlu1 %398 }
 0x174   : > { %v411_v10 = vmul.f32 0.0078125, %v395_v8  ;;  %v413_v11 = vmul.f32 0.0078125, %v399_v9 }
 0x176   : > { %v1060_v12 = vsub.f32 %v386_v59, %v411_v10  ;;  %v1062_v13 = vsub.f32 %v388_v60, %v413_v11  ;;  %v653_v60 = vld [vmem:[%s1175_s4] ss:$0 sm:$0xff] }
 0x177   : > { %v397_v14 = vpop.xlane.xlu0 %396  ;;  %v401_v15 = vpop.xlane.xlu1 %400 }
 0x178   : > { %v412_v16 = vmul.f32 0.0078125, %v397_v14  ;;  %v427_v17 = vmul.f32 %v1060_v12, %v1060_v12  ;;  %v414_v18 = vmul.f32 0.0078125, %v401_v15  ;;  %v429_v21 = vmul.f32 %v1062_v13, %v1062_v13 }
 0x17a   : > { %v1066_v19 = vsub.f32 %v387_v62, %v412_v16  ;;  %435 = vadd.xlane.f32.xlu0 %v427_v17  ;;  %v1068_v20 = vsub.f32 %v389_v63, %v414_v18 }
 0x17b   : > { %v403_v22 = vpop.xlane.xlu0 %402  ;;  %v405_v23 = vpop.xlane.xlu1 %404 }
 0x17c   : > { %v415_v24 = vmul.f32 0.0078125, %v403_v22  ;;  %v428_v25 = vmul.f32 %v1066_v19, %v1066_v19  ;;  %v416_v26 = vmul.f32 0.0078125, %v405_v23  ;;  %v430_v29 = vmul.f32 %v1068_v20, %v1068_v20 }
 0x17e   : > { %v1074_v27 = vsub.f32 %v390_v2, %v415_v24  ;;  %439 = vadd.xlane.f32.xlu0 %v429_v21  ;;  %437 = vadd.xlane.f32.xlu1 %v428_v25  ;;  %v1076_v28 = vsub.f32 %v391_v3, %v416_v26 }
 0x17f   : > { %v407_v30 = vpop.xlane.xlu0 %406  ;;  %v409_v31 = vpop.xlane.xlu1 %408 }
 0x180   : > { %v417_v32 = vmul.f32 0.0078125, %v407_v30  ;;  %v431_v33 = vmul.f32 %v1074_v27, %v1074_v27  ;;  %v418_v34 = vmul.f32 0.0078125, %v409_v31  ;;  %v432_v37 = vmul.f32 %v1076_v28, %v1076_v28 }
 0x182   : > { %v1082_v35 = vsub.f32 %v392_v6, %v417_v32  ;;  %441 = vadd.xlane.f32.xlu1 %v430_v29  ;;  %443 = vadd.xlane.f32.xlu0 %v431_v33  ;;  %v1084_v36 = vsub.f32 %v393_v7, %v418_v34 }
 0x184   : > { %v433_v38 = vmul.f32 %v1082_v35, %v1082_v35  ;;  %v434_v39 = vmul.f32 %v1084_v36, %v1084_v36 }
 0x186   : > { %445 = vadd.xlane.f32.xlu1 %v432_v37  ;;  %447 = vadd.xlane.f32.xlu0 %v433_v38 }
 0x18a   : > { %449 = vadd.xlane.f32.xlu1 %v434_v39 }
 0x207   : > { %v436_v40 = vpop.xlane.xlu0 %435 }
 0x208   : > { %v451_v41 = vmul.f32 0.0078125, %v436_v40 }
 0x20a   : > { %v459_v42 = vadd.f32 1e-12, %v451_v41 }
 0x20b   : > { %v438_v43 = vpop.xlane.xlu1 %437  ;;  %v440_v44 = vpop.xlane.xlu0 %439 }
 0x20c   : > { %741 = vrsqrt.f32 %v459_v42  ;;  %v452_v45 = vmul.f32 0.0078125, %v438_v43  ;;  %v453_v46 = vmul.f32 0.0078125, %v440_v44 }
 0x20e   : > { %v460_v47 = vadd.f32 1e-12, %v452_v45  ;;  %v461_v48 = vadd.f32 1e-12, %v453_v46 }
 0x20f   : > { %v442_v49 = vpop.xlane.xlu1 %441  ;;  %v444_v50 = vpop.xlane.xlu0 %443 }
 0x210   : > { %743 = vrsqrt.f32 %v460_v47  ;;  %v454_v51 = vmul.f32 0.0078125, %v442_v49  ;;  %v455_v52 = vmul.f32 0.0078125, %v444_v50 }
 0x211   : > { %745 = vrsqrt.f32 %v461_v48 }
 0x212   : > { %v462_v53 = vadd.f32 1e-12, %v454_v51  ;;  %v463_v54 = vadd.f32 1e-12, %v455_v52 }
 0x213   : > { %v446_v55 = vpop.xlane.xlu1 %445  ;;  %v448_v56 = vpop.xlane.xlu0 %447 }
 0x214   : > { %747 = vrsqrt.f32 %v462_v53  ;;  %v456_v57 = vmul.f32 0.0078125, %v446_v55  ;;  %v457_v58 = vmul.f32 0.0078125, %v448_v56 }
 0x215   : > { %749 = vrsqrt.f32 %v463_v54 }
 0x216   : > { %v742_v59 = vpop.eup %741  ;;  %v464_v61 = vadd.f32 1e-12, %v456_v57  ;;  %v465_v62 = vadd.f32 1e-12, %v457_v58 }
 0x217   : > { %v475_v63 = vmul.f32 %v742_v59, %v1060_v12  ;;  %v450_v0 = vpop.xlane.xlu1 %449 }
 0x218   : > { %751 = vrsqrt.f32 %v464_v61  ;;  %v458_v2 = vmul.f32 0.0078125, %v450_v0 }
 0x219   : > { %v489_v3 = vmul.f32 %v653_v60, %v475_v63  ;;  %753 = vrsqrt.f32 %v465_v62 }
 0x21a   : > { %v744_v4 = vpop.eup %743  ;;  %v466_v5 = vadd.f32 1e-12, %v458_v2 }
 0x21b   : > { %v746_v6 = vpop.eup %745  ;;  %v501_v7 = vadd.f32 %v654_v1, %v489_v3  ;;  %v476_v8 = vmul.f32 %v744_v4, %v1066_v19 }
 0x21c   : > { %v477_v9 = vmul.f32 %v746_v6, %v1062_v13  ;;  %755 = vrsqrt.f32 %v466_v5 }
 0x21d   : > { %509 = vst [vmem:[%s1002_s23] sm:$0xff] %v501_v7  ;;  %v490_v10 = vmul.f32 %v653_v60, %v476_v8 }
 0x21e   : > { %v748_v11 = vpop.eup %747  ;;  %v491_v12 = vmul.f32 %v653_v60, %v477_v9 }
 0x21f   : > { %v750_v14 = vpop.eup %749  ;;  %v502_v15 = vadd.f32 %v654_v1, %v490_v10  ;;  %v478_v16 = vmul.f32 %v748_v11, %v1068_v20 }
 0x220   : > { %v503_v17 = vadd.f32 %v654_v1, %v491_v12  ;;  %v479_v18 = vmul.f32 %v750_v14, %v1074_v27 }
 0x221   : > { %510 = vst [vmem:[%s1002_s23 + $0x8] sm:$0xff] %v502_v15  ;;  %v492_v21 = vmul.f32 %v653_v60, %v478_v16 }
 0x222   : > { %v752_v19 = vpop.eup %751  ;;  %511 = vst [vmem:[%s1002_s23 + $0x10] sm:$0xff] %v503_v17  ;;  %v493_v13 = vmul.f32 %v653_v60, %v479_v18 }
 0x223   : > { %v754_v22 = vpop.eup %753  ;;  %v504_v23 = vadd.f32 %v654_v1, %v492_v21  ;;  %v480_v24 = vmul.f32 %v752_v19, %v1076_v28 }
 0x224   : > { %v505_v25 = vadd.f32 %v654_v1, %v493_v13  ;;  %v481_v20 = vmul.f32 %v754_v22, %v1082_v35 }
 0x225   : > { %512 = vst [vmem:[%s1002_s23 + $0x18] sm:$0xff] %v504_v23  ;;  %v494_v26 = vmul.f32 %v653_v60, %v480_v24 }
 0x226   : > { %v756_v27 = vpop.eup %755  ;;  %513 = vst [vmem:[%s1002_s23 + $0x20] sm:$0xff] %v505_v25  ;;  %v495_v29 = vmul.f32 %v653_v60, %v481_v20 }
 0x227   : > { %v506_v30 = vadd.f32 %v654_v1, %v494_v26  ;;  %v482_v31 = vmul.f32 %v756_v27, %v1084_v36 }
 0x228   : > { %v507_v32 = vadd.f32 %v654_v1, %v495_v29 }
 0x229   : > { %514 = vst [vmem:[%s1002_s23 + $0x28] sm:$0xff] %v506_v30  ;;  %v496_v33 = vmul.f32 %v653_v60, %v482_v31 }
 0x22a   : > { %515 = vst [vmem:[%s1002_s23 + $0x30] sm:$0xff] %v507_v32 }
 0x22b   : > { %v508_v28 = vadd.f32 %v654_v1, %v496_v33 }
 0x22d   : > { %516 = vst [vmem:[%s1002_s23 + $0x38] sm:$0xff] %v508_v28 }
 0x22e   : > { %806 = shalt.err (!%p803_p12)
}
 0x22f   : > { %s807_s23 = scalar_lea.hbm %s1118_s8, 1024  ;;  %s811_s10 = scalar_lea.hbm %s1177_s6, 4096 }
 0x230   : > { %p808_p0 = scmp.ne.s32.totalorder %s1118_s8, %s807_s23  ;;  %p812_p3 = scmp.lt.u32.totalorder %s1118_s8, %s1177_s6 }
 0x231   : > { %p813_p4 = scmp.lt.u32.totalorder %s811_s10, %s807_s23  ;;  %p815_p5 = scmp.lt.u32.totalorder %s807_s23, %s1118_s8 }
 0x232   : > { %p809_p1 = pnand %p808_p0, %p977_p9 }
 0x233   : > { %p814_p13 = por %p813_p4, %p812_p3 }
 0x234   : > { %p810_p2 = pneg %p809_p1 }
 0x235   : > { %p816_p6 = por %p815_p5, %p814_p13 }
 0x237   : > { %p817_p7 = pnand %p816_p6, %p810_p2 }
 0x239   : > { %820 = shalt.err (!%p817_p7)
}
 0x23a   : > { %s897_s20 = smov 128   ;;  %s898_s25 = smov 8  }
 0x23b   : > { %664 = dma.vmem_to_hbm [thread:$0]  (%p977_p9), %s1120_s21, 1024, %s1118_s8, %s1125_s16, %s897_s20, %s897_s20, %s898_s25  }
 0x23c PF: > { %p670_p8 = scmp.ge.s32.totalorder %s883_s30, 2  ;;  %s547_s7 = sand.u32 1, %s863_s26  }
 0x23d   : > { %p1185_p10 = scmp.ne.s32.totalorder %s1181_s13, 0  ;;  %s548_s12 = scalar_lea.sflag [#allocation7], %s547_s7 }
 0x23f   : > { %p667_p11 = pnand %p670_p8, %p1185_p10 }
 0x241   : > { %858 = dma.done.wait (!%p667_p11), %s548_s12, 1024  }
 0x242   : > { %860 = vsyncadd (!%p667_p11), %s548_s12, 4294966272  ;;  %s25_s30 = sadd.s32 1, %s883_s30   ;;  %s1186_s26 = smov %s867_s27 }
 0x243   : > { %p22_p12 = scmp.ge.s32.totalorder %s25_s30, 6   ;;  %s1187_s27 = smov %s871_s0 }
 0x244   : > { %s1188_s0 = smov %s990_s14  ;;  %s1189_s28 = smov %s879_s29 }
 0x245   : > { %s1190_s29 = smov %s1192_s9  ;;  %24 = sbr.rel (!%p22_p12) target bundleno = 19 (0x13), region = 116 }
 0x24c   :  { %553 = vsyncpa [#allocation7], 1 }
 0x24d   :  { %555 = vsyncpa [#allocation7 + $0x1], 1 }
 0x24e   :  { %556 = vsyncmov [#allocation3] }
 0x251   :  { %s557_s11 = vpop.sfrf %556 }
 0x252   :  { %p660_p9 = scmp.ne.s32.totalorder %s557_s11, 0 }
 0x254   :  { %561 = shalt.err (%p660_p9)  }

</bundles_post_ra>
